<compile_context>
chip_gen: v7x
topology: tpu7x:2x2x1
jax: 0.10.0
libtpu: 0.0.40
codegen_flags: <defaults>
</compile_context>

<pallas_src>
import jax
import jax.numpy as jnp
from jax import lax
from jax.experimental import pallas as pl
from jax.experimental.pallas import tpu as pltpu


def _round_up(x, m):
    return (x + m - 1) // m * m


# --------------------------------------------------------------------------
# Fused kernel: (TM,K)@(K,H) -> +b1 -> ReLU -> contract H with (1,H) -> +b2
#               -> Sigmoid -> lane-dense (1, TM) store
# --------------------------------------------------------------------------
def _disc_kernel(z_ref, w1_ref, b1_ref, w2_ref, b2_ref, o_ref):
    # First Linear on the MXU (bf16 inputs, f32 accumulation).
    z = z_ref[...].astype(jnp.bfloat16)
    h = jnp.dot(z, w1_ref[...], preferred_element_type=jnp.float32)
    h = jnp.maximum(h + b1_ref[...], 0.0)                      # bias + ReLU (f32)
    # Second Linear: contract H of w2 (1,H) with H of h (TM,H) -> (1, TM).
    # Output rows map to lanes => unmasked, lane-dense store.
    o = lax.dot_general(
        w2_ref[...], h.astype(jnp.bfloat16),
        dimension_numbers=(((1,), (1,)), ((), ())),
        preferred_element_type=jnp.float32)
    o = o + b2_ref[...]                                        # scalar bias
    # Sigmoid: exp and reciprocal both go to the EUP slot.
    o_ref[...] = pl.reciprocal(1.0 + jnp.exp(-o), approx=True).astype(o_ref.dtype)


# --------------------------------------------------------------------------
# One-time parameter preparation (hoisted out of the per-call path)
# --------------------------------------------------------------------------
def prepare_params(params):
    H = params["fc1_w"].shape[0]                               # 128
    return {
        "w1": params["fc1_w"].T.astype(jnp.bfloat16),          # (z_dim, H)
        "b1": params["fc1_b"].reshape(1, H).astype(jnp.float32),
        "w2": params["fc2_w"].astype(jnp.bfloat16),            # (1, H) -- no padding
        "b2": params["fc2_b"].reshape(1, 1).astype(jnp.float32),
    }


def _choose_tiling(batch):
    """Row padding / tile size. Single step for small batches; >=2 parallel
    steps (128-aligned TM, capped at 2048) for large ones so both v7x TCs work."""
    mp = max(_round_up(batch, 8), 8)
    if mp <= 1024:
        return mp, mp                       # one grid step; block == full extent
    tm = min(2048, _round_up(pl.cdiv(mp, 2), 128))
    mp = _round_up(mp, tm)
    return mp, tm


def discriminator_forward(z, prep):
    """z: (B, z_dim) f32 -> (B, 1) f32, matching the PyTorch Discriminator."""
    B, z_dim = z.shape
    H = prep["w1"].shape[1]
    Mp, TM = _choose_tiling(B)
    zp = jnp.pad(z, ((0, Mp - B), (0, 0)))      # stays f32; bf16 cast in-kernel

    out = pl.pallas_call(
        _disc_kernel,
        out_shape=jax.ShapeDtypeStruct((Mp // TM, TM), jnp.float32),
        grid=(Mp // TM,),
        in_specs=[
            pl.BlockSpec((TM, z_dim), lambda i: (i, 0)),
            pl.BlockSpec((z_dim, H), lambda i: (0, 0)),
            pl.BlockSpec((1, H), lambda i: (0, 0)),
            pl.BlockSpec((1, H), lambda i: (0, 0)),
            pl.BlockSpec((1, 1), lambda i: (0, 0)),
        ],
        out_specs=pl.BlockSpec((1, TM), lambda i: (i, 0)),
        compiler_params=pltpu.CompilerParams(
            dimension_semantics=("parallel",)),
    )(zp, prep["w1"], prep["b1"], prep["w2"], prep["b2"])

    return out.reshape(Mp)[:B].reshape(B, 1)


# --------------------------------------------------------------------------
# Pure-JAX f32 reference (correctness check)
# --------------------------------------------------------------------------
def reference_forward(z, params):
    h = jnp.maximum(z @ params["fc1_w"].T + params["fc1_b"], 0.0)
    o = h @ params["fc2_w"].T + params["fc2_b"]
    return jax.nn.sigmoid(o)


# --------------------------------------------------------------------------
# Deterministic parameter init (shapes from Discriminator.__init__)
# --------------------------------------------------------------------------
def init_params(key, z_dim, intermediate_size=128):
    k1, k2, k3, k4 = jax.random.split(key, 4)
    s1 = 1.0 / jnp.sqrt(z_dim)
    s2 = 1.0 / jnp.sqrt(intermediate_size)
    return {
        "fc1_w": s1 * jax.random.normal(k1, (intermediate_size, z_dim), jnp.float32),
        "fc1_b": s1 * jax.random.normal(k2, (intermediate_size,), jnp.float32),
        "fc2_w": s2 * jax.random.normal(k3, (1, intermediate_size), jnp.float32),
        "fc2_b": s2 * jax.random.normal(k4, (1,), jnp.float32),
    }


if __name__ == "__main__":
    Z_DIM = 32
    key = jax.random.PRNGKey(0)
    k_z, k_p, k_z2 = jax.random.split(key, 3)
    params = init_params(k_p, Z_DIM)
    prep = jax.tree.map(jax.device_put, prepare_params(params))  # prepared once

    fwd = jax.jit(discriminator_forward)
    ref_fn = jax.jit(reference_forward)

    # --- small batch: single grid step ---
    B = 8
    z = jax.random.normal(k_z, (B, Z_DIM), dtype=jnp.float32)
    out = jax.block_until_ready(fwd(z, prep))
    assert out.shape == (B, 1), out.shape
    assert bool(jnp.all((out >= 0.0) & (out <= 1.0)))
    ref = jax.block_until_ready(ref_fn(z, params))
    assert jnp.allclose(out, ref, atol=2e-2, rtol=2e-2), (
        float(jnp.max(jnp.abs(out - ref))))

    # --- larger batch: exercises the multi-step tiled (lane-dense) path ---
    B2 = 2304
    z2 = jax.random.normal(k_z2, (B2, Z_DIM), dtype=jnp.float32)
    out2 = jax.block_until_ready(fwd(z2, prep))
    assert out2.shape == (B2, 1), out2.shape
    ref2 = jax.block_until_ready(ref_fn(z2, params))
    assert jnp.allclose(out2, ref2, atol=2e-2, rtol=2e-2), (
        float(jnp.max(jnp.abs(out2 - ref2))))

    print("KERNEL_OK")
</pallas_src>

<mosaic_0001>
module attributes {stable_mosaic.version = 11 : i64} {
  func.func @_disc_kernel(%arg0: i32, %arg1: memref<8x32xf32, #tpu.memory_space<vmem>>, %arg2: memref<32x128xbf16, #tpu.memory_space<vmem>>, %arg3: memref<1x128xf32, #tpu.memory_space<vmem>>, %arg4: memref<1x128xbf16, #tpu.memory_space<vmem>>, %arg5: memref<1x1xf32, #tpu.memory_space<vmem>>, %arg6: memref<1x8xf32, #tpu.memory_space<vmem>>) attributes {dimension_semantics = [#tpu.dimension_semantics<parallel>], iteration_bounds = array<i64: 1>, scalar_prefetch = 0 : i64, scratch_operands = 0 : i64, tpu.core_type = #tpu.core_type<tc>, window_params = [{transform_indices = @transform_0, window_bounds = array<i64: 8, 32>}, {pipeline_mode = #tpu.pipeline_mode<synchronous>, transform_indices = @transform_1, window_bounds = array<i64: 32, 128>}, {pipeline_mode = #tpu.pipeline_mode<synchronous>, transform_indices = @transform_2, window_bounds = array<i64: 1, 128>}, {pipeline_mode = #tpu.pipeline_mode<synchronous>, transform_indices = @transform_3, window_bounds = array<i64: 1, 128>}, {pipeline_mode = #tpu.pipeline_mode<synchronous>, transform_indices = @transform_4, window_bounds = array<i64: 1, 1>}, {transform_indices = @transform_5, window_bounds = array<i64: 1, 8>}]} {
    %c0 = arith.constant 0 : index
    %c0_0 = arith.constant 0 : index
    %0 = vector.load %arg1[%c0, %c0_0] : memref<8x32xf32, #tpu.memory_space<vmem>>, vector<8x32xf32>
    %1 = arith.truncf %0 : vector<8x32xf32> to vector<8x32xbf16>
    %c0_1 = arith.constant 0 : index
    %c0_2 = arith.constant 0 : index
    %2 = vector.load %arg2[%c0_1, %c0_2] : memref<32x128xbf16, #tpu.memory_space<vmem>>, vector<32x128xbf16>
    %cst = arith.constant dense<0.000000e+00> : vector<8x128xf32>
    %3 = tpu.matmul %1, %2, %cst {dimension_numbers = #tpu.dot_dimension_numbers<[1], [0], [0], [1], [0, 0, 1, 1], [], []>} : vector<8x32xbf16>, vector<32x128xbf16>, vector<8x128xf32> -> vector<8x128xf32>
    %c0_3 = arith.constant 0 : index
    %c0_4 = arith.constant 0 : index
    %4 = vector.load %arg3[%c0_3, %c0_4] : memref<1x128xf32, #tpu.memory_space<vmem>>, vector<1x128xf32>
    %5 = vector.broadcast %4 : vector<1x128xf32> to vector<8x128xf32>
    %6 = arith.addf %3, %5 : vector<8x128xf32>
    %cst_5 = arith.constant 0.000000e+00 : f32
    %7 = vector.broadcast %cst_5 : f32 to vector<8x128xf32>
    %8 = arith.maximumf %6, %7 : vector<8x128xf32>
    %c0_6 = arith.constant 0 : index
    %c0_7 = arith.constant 0 : index
    %9 = vector.load %arg4[%c0_6, %c0_7] : memref<1x128xbf16, #tpu.memory_space<vmem>>, vector<1x128xbf16>
    %10 = arith.truncf %8 : vector<8x128xf32> to vector<8x128xbf16>
    %cst_8 = arith.constant dense<0.000000e+00> : vector<1x8xf32>
    %11 = tpu.matmul %9, %10, %cst_8 {dimension_numbers = #tpu.dot_dimension_numbers<[1], [1], [0], [0], [0, 0, 1, 0], [], []>} : vector<1x128xbf16>, vector<8x128xbf16>, vector<1x8xf32> -> vector<1x8xf32>
    %c0_9 = arith.constant 0 : index
    %c0_10 = arith.constant 0 : index
    %12 = vector.load %arg5[%c0_9, %c0_10] : memref<1x1xf32, #tpu.memory_space<vmem>>, vector<1x1xf32>
    %13 = vector.broadcast %12 : vector<1x1xf32> to vector<1x8xf32>
    %14 = arith.addf %11, %13 : vector<1x8xf32>
    %cst_11 = arith.constant 0.000000e+00 : f32
    %15 = vector.broadcast %cst_11 : f32 to vector<1x8xf32>
    %16 = arith.subf %15, %14 : vector<1x8xf32>
    %17 = math.exp %16 : vector<1x8xf32>
    %cst_12 = arith.constant 1.000000e+00 : f32
    %18 = vector.broadcast %cst_12 : f32 to vector<1x8xf32>
    %19 = arith.addf %18, %17 : vector<1x8xf32>
    %20 = tpu.reciprocal %19 {approx = true} : vector<1x8xf32> -> vector<1x8xf32>
    %c0_13 = arith.constant 0 : index
    %c0_14 = arith.constant 0 : index
    %21 = vector.load %arg6[%c0_13, %c0_14] : memref<1x8xf32, #tpu.memory_space<vmem>>, vector<1x8xf32>
    tpu.vector_store %arg6[%c0_13, %c0_14], %20 {strides = array<i32>} : memref<1x8xf32, #tpu.memory_space<vmem>>, vector<1x8xf32>,
    return
  }
  func.func @transform_0(%arg0: i32) -> (i32, i32) {
    %c0_i32 = arith.constant 0 : i32
    %c0_i32_0 = arith.constant 0 : i32
    return %arg0, %c0_i32 : i32, i32
  }
  func.func @transform_1(%arg0: i32) -> (i32, i32) {
    %c0_i32 = arith.constant 0 : i32
    %c0_i32_0 = arith.constant 0 : i32
    %c0_i32_1 = arith.constant 0 : i32
    return %c0_i32, %c0_i32_0 : i32, i32
  }
  func.func @transform_2(%arg0: i32) -> (i32, i32) {
    %c0_i32 = arith.constant 0 : i32
    %c0_i32_0 = arith.constant 0 : i32
    %c0_i32_1 = arith.constant 0 : i32
    return %c0_i32, %c0_i32_0 : i32, i32
  }
  func.func @transform_3(%arg0: i32) -> (i32, i32) {
    %c0_i32 = arith.constant 0 : i32
    %c0_i32_0 = arith.constant 0 : i32
    %c0_i32_1 = arith.constant 0 : i32
    return %c0_i32, %c0_i32_0 : i32, i32
  }
  func.func @transform_4(%arg0: i32) -> (i32, i32) {
    %c0_i32 = arith.constant 0 : i32
    %c0_i32_0 = arith.constant 0 : i32
    %c0_i32_1 = arith.constant 0 : i32
    return %c0_i32, %c0_i32_0 : i32, i32
  }
  func.func @transform_5(%arg0: i32) -> (i32, i32) {
    %c0_i32 = arith.constant 0 : i32
    %c0_i32_0 = arith.constant 0 : i32
    return %arg0, %c0_i32 : i32, i32
  }
}

</mosaic_0001>

<bundles_post_ra>
// kernel: discriminator_forward.1
= control target key start
LH: loop header
LB: loop body
LE: loop exit
PB: predicated region body
PF: predicated region fallthrough
CT: control target
= control target key end

     0   :  { %s395_s0 = inlined_call_operand.hbm [shape: f32[8,32], index: 0, kind: input, shape index: {}]   ;;  %s396_s1 = inlined_call_operand.hbm [shape: bf16[32,128], index: 1, kind: input, shape index: {}]   ;;  %s397_s2 = inlined_call_operand.vmem [shape: f32[1,128], index: 2, kind: input, shape index: {}]   ;;  %s398_s3 = inlined_call_operand.vmem [shape: bf16[1,128], index: 3, kind: input, shape index: {}]   ;;  %s399_s4 = inlined_call_operand.<no memory space> [shape: f32[1,1], index: 4, kind: input, shape index: {}]   ;;  %s400_s5 = inlined_call_operand.hbm [shape: f32[1,8], index: 5, kind: output, shape index: {}]  }
   0x1   :  { %v10_v0 = vstv %s399_s4 }
   0x2   :  { %11 = vst [vmem:[#allocation2] sm:$0x1] %v10_v0 }
   0x3   :  { %12 = vsyncpa [#allocation4], 0 }
   0x4   :  { %13 = vsyncpa [#allocation7], 0 }
   0x5   :  { %14 = vsyncpa [#allocation5], 0  ;;  %s305_s20 = smov [#allocation3]   ;;  %s306_s22 = smov [#allocation6]  }
   0x6   :  { %s21_s21 = sshll.u32 %s305_s20, 4  ;;  %s30_s23 = sshll.u32 %s306_s22, 4  ;;  %s22_s21 = int_to_ptr.vmem [resolvable:$true] %s21_s21  ;;  %s346_s23 = int_to_ptr.vmem [resolvable:$true] %s30_s23 }
   0x7   :  { %s233_s26 = scalar_lea.hbm %s395_s0, 128 }
   0x8   :  { %p234_p0 = scmp.ne.s32.totalorder %s395_s0, %s233_s26  ;;  %p237_p1 = scmp.lt.u32.totalorder %s233_s26, %s395_s0 }
   0xa   :  { %p239_p2 = pnand %p237_p1, %p234_p0 }
   0xc   :  { %242 = shalt.err (!%p239_p2)
}
   0xd   :  { %s243_s30 = scalar_lea.vmem %s22_s21, 128  ;;  %p248_p4 = scmp.lt.s32.totalorder %s22_s21, %s22_s21 }
   0xe   :  { %p244_p3 = scmp.ne.s32.totalorder %s22_s21, %s243_s30  ;;  %p249_p5 = scmp.lt.s32.totalorder %s243_s30, %s243_s30 }
  0x10   :  { %p250_p6 = por %p249_p5, %p248_p4 }
  0x12   :  { %p251_p7 = pnand %p250_p6, %p244_p3 }
  0x14   :  { %254 = shalt.err (!%p251_p7)
}
  0x15   :  { %24 = dma.hbm_to_vmem [thread:$0]  %s395_s0, 128, %s22_s21, [#allocation4]  }
  0x16   :  { %s255_s10 = scalar_lea.hbm %s396_s1, 256 }
  0x17   :  { %p256_p8 = scmp.ne.s32.totalorder %s396_s1, %s255_s10  ;;  %p259_p9 = scmp.lt.u32.totalorder %s255_s10, %s396_s1 }
  0x19   :  { %p261_p10 = pnand %p259_p9, %p256_p8 }
  0x1b   :  { %264 = shalt.err (!%p261_p10)
}
  0x1c   :  { %s265_s15 = scalar_lea.vmem %s346_s23, 256  ;;  %p270_p12 = scmp.lt.s32.totalorder %s346_s23, %s346_s23 }
  0x1d   :  { %p266_p11 = scmp.ne.s32.totalorder %s346_s23, %s265_s15  ;;  %p271_p13 = scmp.lt.s32.totalorder %s265_s15, %s265_s15 }
  0x1f   :  { %p272_p0 = por %p271_p13, %p270_p12 }
  0x21   :  { %p273_p1 = pnand %p272_p0, %p266_p11 }
  0x23   :  { %276 = shalt.err (!%p273_p1)
}
  0x24   :  { %s307_s0 = smov 64   ;;  %s308_s16 = smov 4  }
  0x25   :  { %36 = dma.hbm_to_vmem [thread:$0]  %s396_s1, 256, %s346_s23, [#allocation7], %s307_s0, %s307_s0, %s308_s16  }
  0x26   :  { %299 = dma.done.wait [#allocation4], 128  }
  0x27   :  { %300 = vsyncadd [#allocation4], 4294967168 }
  0x28   :  { %301 = dma.done.wait [#allocation7], 256  }
  0x29   :  { %302 = vsyncadd [#allocation7], 4294967040  ;;  %v309_v1 = vmov 0.0   ;;  %vm310_vm0 = vmmov 0   ;;  %v227_v2 = vld [vmem:[#allocation6] sm:$0xff]   ;;  %v228_v3 = vld [vmem:[#allocation6 + $0x8] sm:$0xff]   ;;  %v128_v17 = vlaneseq }
  0x2a   :  { %204 = vmatprep.subr.bf16.mxu0 %v309_v1  ;;  %208 = vmatprep.mubr.msk.bf16.mxu0 %vm310_vm0, %v309_v1  ;;  %v50_v4 = vld [vmem:[#allocation3] sm:$0xff]  ;;  %vm75_vm1 = vcmask 261120   ;;  %v122_v6 = vld [vmem:[#allocation2] sm:$0x1]  ;;  %v311_v7 = vmov 0   ;;  %vm177_vm2 = vcmask 57344  }
  0x2b   :  { %212 = vmatprep.subr.bf16.mxu1 %v309_v1  ;;  %214 = vmatprep.mubr.msk.bf16.mxu1 %vm310_vm0, %v309_v1  ;;  %v51_v5 = vpack.c.bf16 %v50_v4, %v50_v4  ;;  %v195_v8 = vld [vmem:[%s397_s2] ss:$0 sm:$0xff]  ;;  %v129_v18 = vshrl.u32 %v128_v17, 7  ;;  %s312_s2 = smov [#allocation8]  }
  0x2c   :  { %205 = vmatpush3.bf16.msra.mxu0 %v227_v2  ;;  %226 = vset.pattern.permute.xlu0 %v311_v7  ;;  %v120_v16 = vld [vmem:[%s398_s3] sm:$0x1]  ;;  %s185_s22 = sshll.u32 %s312_s2, 4  ;;  %s186_s22 = int_to_ptr.vmem [resolvable:$true] %s185_s22 }
  0x2d   :  { %206 = vmatprep.subr.bf16.mxu0 %v309_v1  ;;  %125 = vperm.xlu0 %226, %v122_v6   ;;  %v130_v19 = vsub.s32 0, %v129_v18  ;;  %s277_s3 = scalar_lea.vmem %s186_s22, 16  ;;  %s281_s23 = scalar_lea.vmem %s186_s22, 32 }
  0x2e   :  { %p278_p2 = scmp.ne.s32.totalorder %s186_s22, %s277_s3  ;;  %p282_p3 = scmp.lt.s32.totalorder %s186_s22, %s186_s22 }
  0x2f   :  { %p283_p4 = scmp.lt.s32.totalorder %s281_s23, %s277_s3 }
  0x30   :  { %207 = vmatpush3.bf16.msra.mxu0 %v228_v3 }
  0x31   :  { %p284_p5 = por %p283_p4, %p282_p3 }
  0x33   :  { %209 = vmatmul.mubr.msk.bf16.vlgmr.msra.gmra.mrb[0].mxu0 %vm75_vm1, %v51_v5  ;;  %p285_p6 = pnand %p284_p5, %p278_p2 }
  0xac   :  { %v126_v20 = vpop.permute.xlu0 %125 }
  0xad   :  { %v131_v21 = vrot.slane %v126_v20, %v130_v19 }
 0x106   :  { %v113_v9 = vpop.f32.mrb[0].mxu0 }
 0x107   :  { %v114_v10 = vadd.f32 %v195_v8, %v113_v9  ;;  %v210_v11 = vpop.f32.mrb[1].mxu0 }
 0x108   :  { %v116_v12 = vpop.f32.mrb[2].mxu0 }
 0x109   :  { %v119_v13 = vmax.f32 %v114_v10, 0.0  ;;  %v211_v14 = vpop.f32.mrb[3].mxu0 }
 0x10b   :  { %v121_v15 = vpack.c.bf16 %v119_v13, %v119_v13 }
 0x10d   :  { %213 = vmatpush3.bf16.xpose.msra.mxu1 %v121_v15 }
 0x114   :  { %215 = vmatmul.mubr.bf16.vlgmr.msra.gmra.mrb[0].mxu1 %v120_v16 }
 0x1e7   :  { %v166_v22 = vpop.f32.mrb[0].mxu1 }
 0x1e8   :  { %v167_v23 = vadd.f32 %v166_v22, %v131_v21  ;;  %v216_v24 = vpop.f32.mrb[1].mxu1 }
 0x1e9   :  { %v169_v25 = vpop.f32.mrb[2].mxu1 }
 0x1ea   :  { %v172_v26 = vsub.f32 0.0, %v167_v23  ;;  %v217_v27 = vpop.f32.mrb[3].mxu1 }
 0x1ec   :  { %v173_v28 = vmul.f32 1.442695, %v172_v26 }
 0x1ee   :  { %229 = vpow2.f32 %v173_v28 }
 0x1f8   :  { %v230_v29 = vpop.eup %229 }
 0x1f9   :  { %v175_v30 = vadd.f32 1.0, %v230_v29 }
 0x1fb   :  { %231 = vrcp.f32 %v175_v30 }
 0x205   :  { %v232_v31 = vpop.eup %231 }
 0x206   :  { %178 = vst.msk [vmem:[#allocation8] sm:$0x1] %vm177_vm2, %v232_v31 }
 0x207   :  { %288 = shalt.err (!%p285_p6)
}
 0x208   :  { %s289_s26 = scalar_lea.hbm %s400_s5, 16 }
 0x209   :  { %p290_p7 = scmp.ne.s32.totalorder %s400_s5, %s289_s26  ;;  %p293_p8 = scmp.lt.u32.totalorder %s289_s26, %s400_s5 }
 0x20b   :  { %p295_p9 = pnand %p293_p8, %p290_p7 }
 0x20d   :  { %298 = shalt.err (!%p295_p9)
}
 0x20e   :  { %188 = dma.vmem_to_hbm [thread:$0]  %s186_s22, 16, %s400_s5, [#allocation5]  }
 0x20f   :  { %303 = dma.done.wait [#allocation5], 16  }
 0x210   :  { %304 = vsyncadd [#allocation5], 4294967280 }
 0x211   :  { %192 = vsyncpa [#allocation4], 1 }
 0x212   :  { %193 = vsyncpa [#allocation7], 1 }
 0x213   :  { %194 = vsyncpa [#allocation5], 1 }

</bundles_post_ra>
